<compile_context>
chip_gen: v7x
topology: tpu7x:2x2x1
jax: 0.10.0
libtpu: 0.0.40
codegen_flags: <defaults>
</compile_context>

<pallas_src>
import functools

import jax
import jax.numpy as jnp
from jax.experimental import pallas as pl
from jax.experimental.pallas import tpu as pltpu


def _round_up(x: int, m: int) -> int:
    return ((x + m - 1) // m) * m


def ihc_projector_kernel(x_ref, w1_ref, b1_ref, w2_ref, b2_ref, o_ref):
    # x:  (TM, D_in)  activation tile
    # w1: (D_in, H)   fc1 weight, pre-transposed to (in, out), bf16
    # b1: (1, H)      fc1 bias, f32
    # w2: (H, D_in)   fc2 weight, pre-transposed to (in, out), bf16
    # b2: (1, D_in)   fc2 bias, f32
    x = x_ref[...]

    h = jnp.dot(x.astype(w1_ref.dtype), w1_ref[...],
                preferred_element_type=jnp.float32)
    h = jnp.maximum(h + b1_ref[...], 0.0)

    y = jnp.dot(h.astype(w2_ref.dtype), w2_ref[...],
                preferred_element_type=jnp.float32)
    y = jnp.maximum(y + b2_ref[...], 0.0)

    o_ref[...] = y.astype(o_ref.dtype)


def prepare_ihc_projector_params(w1, b1, w2, b2, *, param_dtype=jnp.bfloat16):
    """One-time layout prep — do this at model init, NOT per forward call.

    PyTorch nn.Linear convention in: w1 (H, D_in), b1 (H,), w2 (D_in, H),
    b2 (D_in,).  Weights are transposed to (in, out) so the kernel runs plain
    (M,K)x(K,N) matmuls (no in-kernel transposes), cast to bf16 (half the DMA
    bytes, 2x MXU rate), and biases reshaped to (1, out) for a lane-dense
    broadcast add.
    """
    w1t = jnp.asarray(w1, jnp.float32).T.astype(param_dtype)   # (D_in, H)
    w2t = jnp.asarray(w2, jnp.float32).T.astype(param_dtype)   # (H, D_in)
    b1r = jnp.asarray(b1, jnp.float32).reshape(1, -1)          # (1, H)
    b2r = jnp.asarray(b2, jnp.float32).reshape(1, -1)          # (1, D_in)
    return w1t, b1r, w2t, b2r


def _choose_tile_m(n_rows: int, max_tile: int = 1024, min_grid: int = 4) -> int:
    """Largest row tile (<= max_tile, multiple of 8) giving >= min_grid steps,
    so both v7x TensorCores get work with >= 2 pipelined steps each."""
    if n_rows <= 8:
        return n_rows                      # single full-extent block is always legal
    tile = min(max_tile, _round_up(pl.cdiv(n_rows, min_grid), 8))
    return min(tile, _round_up(n_rows, 8))


@functools.partial(jax.jit, static_argnames=("tile_m", "out_dtype"))
def ihc_projector(x, w1t, b1r, w2t, b2r, *, tile_m=None, out_dtype=None):
    """x: (N, D_in) activations.  (w1t, b1r, w2t, b2r) from
    prepare_ihc_projector_params().  Returns (N, D_in) in `out_dtype`
    (defaults to x.dtype)."""
    N, D_in = x.shape
    H = w1t.shape[1]
    if out_dtype is None:
        out_dtype = x.dtype
    out_itemsize = jnp.dtype(out_dtype).itemsize

    if tile_m is None:
        tile_m = _choose_tile_m(N)
    grid = (pl.cdiv(N, tile_m),)           # no jnp.pad: partial last block is masked

    nbytes = lambda a: a.size * a.dtype.itemsize
    weight_bytes = nbytes(w1t) + nbytes(w2t) + nbytes(b1r) + nbytes(b2r)

    # Resident weights are double-buffered by default; once they are big enough
    # to matter for v7x's smaller VMEM, single-buffer them (constant index_map
    # means the second buffer is pure waste).
    single_buffer_weights = weight_bytes > (4 << 20)

    def _resident_spec(arr):
        if single_buffer_weights:
            return pl.BlockSpec(arr.shape, lambda i: (0, 0),
                                pipeline_mode=pl.Buffered(1))
        return pl.BlockSpec(arr.shape, lambda i: (0, 0))

    in_specs = [
        pl.BlockSpec((tile_m, D_in), lambda i: (i, 0)),   # streamed x tile
        _resident_spec(w1t),                              # fc1 weight (resident)
        _resident_spec(b1r),                              # fc1 bias
        _resident_spec(w2t),                              # fc2 weight (resident)
        _resident_spec(b2r),                              # fc2 bias
    ]
    out_specs = pl.BlockSpec((tile_m, D_in), lambda i: (i, 0))

    # VMEM budget: double-buffered x/out tiles + weights + f32 intermediates,
    # with headroom; stays under v7x's 64 MiB physical VMEM.
    vmem_needed = (
        2 * tile_m * D_in * x.dtype.itemsize       # x tile, double-buffered
        + 2 * tile_m * D_in * out_itemsize         # out tile, double-buffered
        + (1 if single_buffer_weights else 2) * weight_bytes
        + tile_m * H * 4                           # f32 hidden tile
        + tile_m * D_in * 4                        # f32 output tile before cast
    )
    vmem_limit = min(max(int(1.5 * vmem_needed), 32 << 20), 48 << 20)

    cost = pl.CostEstimate(
        flops=4 * N * D_in * H,                    # two matmuls
        transcendentals=0,
        bytes_accessed=(N * D_in * x.dtype.itemsize
                        + weight_bytes
                        + N * D_in * out_itemsize))

    return pl.pallas_call(
        ihc_projector_kernel,
        out_shape=jax.ShapeDtypeStruct((N, D_in), out_dtype),
        grid=grid,
        in_specs=in_specs,
        out_specs=out_specs,
        compiler_params=pltpu.CompilerParams(
            dimension_semantics=("parallel",),
            vmem_limit_bytes=vmem_limit),
        cost_estimate=cost,
    )(x, w1t, b1r, w2t, b2r)


if __name__ == "__main__":
    # Small shapes consistent with the module: a 2-layer MLP projector.
    N = 256      # batch of instances
    D_IN = 128   # input_dim
    HID = 256    # hidden_dim

    key = jax.random.PRNGKey(0)
    kx, k1, k2, k3, k4 = jax.random.split(key, 5)

    x = jax.random.normal(kx, (N, D_IN), dtype=jnp.float32)
    # PyTorch nn.Linear convention: weight is (out_features, in_features).
    w1 = 0.05 * jax.random.normal(k1, (HID, D_IN), dtype=jnp.float32)
    b1 = 0.05 * jax.random.normal(k2, (HID,), dtype=jnp.float32)
    w2 = 0.05 * jax.random.normal(k3, (D_IN, HID), dtype=jnp.float32)
    b2 = 0.05 * jax.random.normal(k4, (D_IN,), dtype=jnp.float32)

    # One-time param prep (model init), then the hot-path call.
    params = prepare_ihc_projector_params(w1, b1, w2, b2)
    out = ihc_projector(x, *params)
    out = jax.block_until_ready(out)

    assert out.shape == (N, D_IN) and out.dtype == jnp.float32
    assert bool(jnp.all(out >= 0.0))          # ReLU output is non-negative

    # Reference check (bf16 weights on the MXU -> loose tolerance).
    ref = jnp.maximum(jnp.maximum(x @ w1.T + b1, 0.0) @ w2.T + b2, 0.0)
    rel_err = float(jnp.max(jnp.abs(out - ref)) / (jnp.max(jnp.abs(ref)) + 1e-6))
    assert rel_err < 3e-2, rel_err

    print("KERNEL_OK")
</pallas_src>

<mosaic_0001>
module attributes {stable_mosaic.version = 11 : i64} {
  func.func @ihc_projector_kernel(%arg0: i32, %arg1: memref<64x128xf32, #tpu.memory_space<vmem>>, %arg2: memref<128x256xbf16, #tpu.memory_space<vmem>>, %arg3: memref<1x256xf32, #tpu.memory_space<vmem>>, %arg4: memref<256x128xbf16, #tpu.memory_space<vmem>>, %arg5: memref<1x128xf32, #tpu.memory_space<vmem>>, %arg6: memref<64x128xf32, #tpu.memory_space<vmem>>) attributes {dimension_semantics = [#tpu.dimension_semantics<parallel>], iteration_bounds = array<i64: 4>, scalar_prefetch = 0 : i64, scratch_operands = 0 : i64, tpu.core_type = #tpu.core_type<tc>, window_params = [{transform_indices = @transform_0, window_bounds = array<i64: 64, 128>}, {pipeline_mode = #tpu.pipeline_mode<synchronous>, transform_indices = @transform_1, window_bounds = array<i64: 128, 256>}, {pipeline_mode = #tpu.pipeline_mode<synchronous>, transform_indices = @transform_2, window_bounds = array<i64: 1, 256>}, {pipeline_mode = #tpu.pipeline_mode<synchronous>, transform_indices = @transform_3, window_bounds = array<i64: 256, 128>}, {pipeline_mode = #tpu.pipeline_mode<synchronous>, transform_indices = @transform_4, window_bounds = array<i64: 1, 128>}, {transform_indices = @transform_5, window_bounds = array<i64: 64, 128>}]} {
    %c0 = arith.constant 0 : index
    %c0_0 = arith.constant 0 : index
    %0 = vector.load %arg1[%c0, %c0_0] : memref<64x128xf32, #tpu.memory_space<vmem>>, vector<64x128xf32>
    %1 = arith.truncf %0 : vector<64x128xf32> to vector<64x128xbf16>
    %c0_1 = arith.constant 0 : index
    %c0_2 = arith.constant 0 : index
    %2 = vector.load %arg2[%c0_1, %c0_2] : memref<128x256xbf16, #tpu.memory_space<vmem>>, vector<128x256xbf16>
    %cst = arith.constant dense<0.000000e+00> : vector<64x256xf32>
    %3 = tpu.matmul %1, %2, %cst {dimension_numbers = #tpu.dot_dimension_numbers<[1], [0], [0], [1], [0, 0, 1, 1], [], []>} : vector<64x128xbf16>, vector<128x256xbf16>, vector<64x256xf32> -> vector<64x256xf32>
    %c0_3 = arith.constant 0 : index
    %c0_4 = arith.constant 0 : index
    %4 = vector.load %arg3[%c0_3, %c0_4] : memref<1x256xf32, #tpu.memory_space<vmem>>, vector<1x256xf32>
    %5 = vector.broadcast %4 : vector<1x256xf32> to vector<64x256xf32>
    %6 = arith.addf %3, %5 : vector<64x256xf32>
    %cst_5 = arith.constant 0.000000e+00 : f32
    %7 = vector.broadcast %cst_5 : f32 to vector<64x256xf32>
    %8 = arith.maximumf %6, %7 : vector<64x256xf32>
    %9 = arith.truncf %8 : vector<64x256xf32> to vector<64x256xbf16>
    %c0_6 = arith.constant 0 : index
    %c0_7 = arith.constant 0 : index
    %10 = vector.load %arg4[%c0_6, %c0_7] : memref<256x128xbf16, #tpu.memory_space<vmem>>, vector<256x128xbf16>
    %cst_8 = arith.constant dense<0.000000e+00> : vector<64x128xf32>
    %11 = tpu.matmul %9, %10, %cst_8 {dimension_numbers = #tpu.dot_dimension_numbers<[1], [0], [0], [1], [0, 0, 1, 1], [], []>} : vector<64x256xbf16>, vector<256x128xbf16>, vector<64x128xf32> -> vector<64x128xf32>
    %c0_9 = arith.constant 0 : index
    %c0_10 = arith.constant 0 : index
    %12 = vector.load %arg5[%c0_9, %c0_10] : memref<1x128xf32, #tpu.memory_space<vmem>>, vector<1x128xf32>
    %13 = vector.broadcast %12 : vector<1x128xf32> to vector<64x128xf32>
    %14 = arith.addf %11, %13 : vector<64x128xf32>
    %cst_11 = arith.constant 0.000000e+00 : f32
    %15 = vector.broadcast %cst_11 : f32 to vector<64x128xf32>
    %16 = arith.maximumf %14, %15 : vector<64x128xf32>
    %c0_12 = arith.constant 0 : index
    %c0_13 = arith.constant 0 : index
    %17 = vector.load %arg6[%c0_12, %c0_13] : memref<64x128xf32, #tpu.memory_space<vmem>>, vector<64x128xf32>
    tpu.vector_store %arg6[%c0_12, %c0_13], %16 {strides = array<i32>} : memref<64x128xf32, #tpu.memory_space<vmem>>, vector<64x128xf32>,
    return
  }
  func.func @transform_0(%arg0: i32) -> (i32, i32) {
    %c0_i32 = arith.constant 0 : i32
    %c0_i32_0 = arith.constant 0 : i32
    return %arg0, %c0_i32 : i32, i32
  }
  func.func @transform_1(%arg0: i32) -> (i32, i32) {
    %c0_i32 = arith.constant 0 : i32
    %c0_i32_0 = arith.constant 0 : i32
    %c0_i32_1 = arith.constant 0 : i32
    return %c0_i32, %c0_i32_0 : i32, i32
  }
  func.func @transform_2(%arg0: i32) -> (i32, i32) {
    %c0_i32 = arith.constant 0 : i32
    %c0_i32_0 = arith.constant 0 : i32
    %c0_i32_1 = arith.constant 0 : i32
    return %c0_i32, %c0_i32_0 : i32, i32
  }
  func.func @transform_3(%arg0: i32) -> (i32, i32) {
    %c0_i32 = arith.constant 0 : i32
    %c0_i32_0 = arith.constant 0 : i32
    %c0_i32_1 = arith.constant 0 : i32
    return %c0_i32, %c0_i32_0 : i32, i32
  }
  func.func @transform_4(%arg0: i32) -> (i32, i32) {
    %c0_i32 = arith.constant 0 : i32
    %c0_i32_0 = arith.constant 0 : i32
    %c0_i32_1 = arith.constant 0 : i32
    return %c0_i32, %c0_i32_0 : i32, i32
  }
  func.func @transform_5(%arg0: i32) -> (i32, i32) {
    %c0_i32 = arith.constant 0 : i32
    %c0_i32_0 = arith.constant 0 : i32
    return %arg0, %c0_i32 : i32, i32
  }
}

</mosaic_0001>

<bundles_post_ra>
// kernel: ihc_projector.1
= control target key start
LH: loop header
LB: loop body
LE: loop exit
PB: predicated region body
PF: predicated region fallthrough
CT: control target
= control target key end

     0   :  { %10 = vsyncpa [#allocation3], 0  ;;  %s1486_s0 = inlined_call_operand.hbm [shape: f32[256,128], index: 0, kind: input, shape index: {}]   ;;  %s1487_s1 = inlined_call_operand.hbm [shape: bf16[128,256], index: 1, kind: input, shape index: {}]   ;;  %s1488_s2 = inlined_call_operand.vmem [shape: f32[1,256], index: 2, kind: input, shape index: {}]   ;;  %s1489_s3 = inlined_call_operand.hbm [shape: bf16[256,128], index: 3, kind: input, shape index: {}]   ;;  %s1490_s4 = inlined_call_operand.vmem [shape: f32[1,128], index: 4, kind: input, shape index: {}]   ;;  %s1491_s5 = inlined_call_operand.hbm [shape: f32[256,128], index: 5, kind: output, shape index: {}]  }
   0x1   :  { %12 = vsyncpa [#allocation3 + $0x1], 0 }
   0x2   :  { %13 = vsyncpa [#allocation6], 0 }
   0x3   :  { %14 = vsyncpa [#allocation4], 0 }
   0x4   :  { %16 = vsyncpa [#allocation4 + $0x1], 0  ;;  %s1220_s18 = smov 0   ;;  %s1222_s19 = smov 0  }
   0x5   :  { %s1224_s20 = smov 0   ;;  %s1226_s21 = smov 0  }
   0x6 LB: > { %s1241_s22 = sadd.s32 4294967295, %s1177_s21   ;;  %s814_s23 = sadd.s32 4294967294, %s1177_s21   ;;  %s1177_s21 = sphi %s1226_s21, %s1510_s21   ;;  %s1173_s20 = sphi %s1224_s20, %s1509_s20   ;;  %s1169_s19 = sphi %s1222_s19, %s1508_s19   ;;  %s1165_s18 = sphi %s1220_s18, %s1507_s18  }
   0x7   : > { %p42_p0 = scmp.ne.s32.totalorder %s1169_s19, %s1165_s18  ;;  %p1492_p1 = scmp.eq.s32.totalorder %s1241_s22, 0 }
   0x8   : > { %p156_p3 = scmp.eq.s32.totalorder %s814_s23, 3  ;;  %p815_p5 = scmp.ge.s32.totalorder %s1177_s21, 1 }
   0x9   : > { %p1250_p4 = por %p1492_p1, %p42_p0  ;;  %p163_p7 = scmp.lt.s32.totalorder %s1177_s21, 5 }
   0xa   : > { %p1255_p6 = por %p156_p3, %p42_p0  ;;  %s1179_s27 = smov [#allocation5]  }
   0xb   : > { %s1495_s24 = scalar_select %p1250_p4, 1, 0 }
   0xc   : > { %s1496_s25 = scalar_select %p1255_p6, 1, 0 }
   0xd   : > { %p1260_p8 = pnand %p815_p5, %p163_p7  ;;  %s175_s28 = sshll.u32 %s1179_s27, 4  ;;  %s176_s28 = int_to_ptr.vmem [resolvable:$true] %s175_s28 }
   0xe   : > { %s1180_s30 = smov [#allocation7]   ;;  %s1021_s9 = scalar_lea.hbm %s1487_s1, 2048 }
   0xf   : > { %s1497_s26 = scalar_select %p1260_p8, 1, 0 }
  0x10   : > { %p919_p9 = pneg %p1260_p8  ;;  %s191_s6 = sshll.u32 %s1180_s30, 4  ;;  %s1272_s6 = int_to_ptr.vmem [resolvable:$true] %s191_s6 }
  0x11   : > { %p1022_p11 = scmp.ne.s32.totalorder %s1487_s1, %s1021_s9  ;;  %p1028_p3 = scmp.lt.u32.totalorder %s1021_s9, %s1487_s1 }
  0x12   : > { %p1268_p10 = pnand %p919_p9, %p1492_p1 }
  0x14   : > { %p1023_p12 = pneg %p1268_p10 }
  0x16   : > { %p1024_p13 = pnand %p1023_p12, %p1022_p11 }
  0x18   : > { %p1025_p0 = pneg %p1024_p13 }
  0x1a   : > { %p1030_p5 = pnand %p1028_p3, %p1025_p0 }
  0x1c   : > { %1033 = shalt.err (!%p1030_p5)
}
  0x1d   : > { %s1034_s14 = scalar_lea.vmem %s176_s28, 2048  ;;  %p1042_p2 = scmp.lt.s32.totalorder %s176_s28, %s176_s28 }
  0x1e   : > { %p1035_p7 = scmp.ne.s32.totalorder %s176_s28, %s1034_s14  ;;  %p1043_p6 = scmp.lt.s32.totalorder %s1034_s14, %s1034_s14 }
  0x20   : > { %p1037_p9 = pnand %p1035_p7, %p1023_p12  ;;  %p1044_p4 = por %p1043_p6, %p1042_p2 }
  0x22   : > { %p1038_p1 = pneg %p1037_p9 }
  0x24   : > { %p1045_p8 = pnand %p1044_p4, %p1038_p1 }
  0x26   : > { %1048 = shalt.err (!%p1045_p8)
}
  0x27   : > { %s1181_s15 = smov 128   ;;  %s1182_s16 = smov 8  }
  0x28   : > { %922 = dma.hbm_to_vmem [thread:$0]  (!%p1268_p10), %s1487_s1, 2048, %s176_s28, [#allocation6], %s1181_s15, %s1181_s15, %s1182_s16  }
  0x29   : > { %s1049_s7 = scalar_lea.hbm %s1489_s3, 2048 }
  0x2a   : > { %p1050_p1 = scmp.ne.s32.totalorder %s1489_s3, %s1049_s7  ;;  %p1056_p6 = scmp.lt.u32.totalorder %s1049_s7, %s1489_s3 }
  0x2c   : > { %p1052_p2 = pnand %p1050_p1, %p1023_p12 }
  0x2e   : > { %p1053_p4 = pneg %p1052_p2 }
  0x30   : > { %p1058_p8 = pnand %p1056_p6, %p1053_p4 }
  0x32   : > { %1061 = shalt.err (!%p1058_p8)
}
  0x33   : > { %s1062_s28 = scalar_lea.vmem %s1272_s6, 2048  ;;  %p1070_p3 = scmp.lt.s32.totalorder %s1272_s6, %s1272_s6 }
  0x34   : > { %p1063_p11 = scmp.ne.s32.totalorder %s1272_s6, %s1062_s28  ;;  %p1071_p5 = scmp.lt.s32.totalorder %s1062_s28, %s1062_s28 }
  0x36   : > { %p1065_p13 = pnand %p1063_p11, %p1023_p12  ;;  %p1072_p7 = por %p1071_p5, %p1070_p3 }
  0x38   : > { %p1066_p0 = pneg %p1065_p13 }
  0x3a   : > { %p1073_p9 = pnand %p1072_p7, %p1066_p0 }
  0x3c   : > { %1076 = shalt.err (!%p1073_p9)
}
  0x3d   : > { %s1183_s12 = smov 64   ;;  %s1184_s13 = smov 4  }
  0x3e   : > { %925 = dma.hbm_to_vmem [thread:$0]  (!%p1268_p10), %s1489_s3, 2048, %s1272_s6, [#allocation6], %s1183_s12, %s1183_s12, %s1184_s13  }
  0x3f   : > { %s1325_s23 = sadd.s32 1, %s1177_s21   ;;  %s29_s30 = sadd.s32 1, %s1173_s20 }
  0x40   : > { %s26_s27 = ssub.s32 %s1177_s21, %s1325_s23  ;;  %p36_p1 = scmp.ne.s32.totalorder %s1173_s20, %s1169_s19 }
  0x41   : > { %p27_p12 = scmp.eq.s32.totalorder %s26_s27, 0  ;;  %p37_p2 = scmp.eq.s32.totalorder %s1177_s21, 0 }
  0x42   : > { %p1499_p6 = scmp.eq.s32.totalorder %s1241_s22, 3  ;;  %p936_p11 = scmp.lt.s32.totalorder %s1177_s21, 4 }
  0x43   : > { %s1334_s7 = scalar_select %p27_p12, %s1173_s20, %s29_s30  }
  0x44   : > { %p38_p4 = por %p37_p2, %p36_p1  ;;  %p1338_p8 = por %p1499_p6, %p36_p1 }
  0x45   : > { %s208_s29 = sand.u32 1, %s1173_s20   ;;  %s865_s6 = sshll.u32 %s1177_s21, 10 }
  0x46   : > { %s819_s9 = sshll.u32 %s208_s29, 6  ;;  %s1348_s28 = scalar_lea.hbm %s1486_s0, %s865_s6 }
  0x47   : > { %s212_s12 = scalar_lea.vmem [#allocation2], %s819_s9  ;;  %p1352_p10 = pnand %p936_p11, %p38_p4 }
  0x48   : > { %s219_s13 = sshll.u32 %s212_s12, 4  ;;  %s1356_s17 = scalar_lea.sflag [#allocation3], %s208_s29  ;;  %s1350_s13 = int_to_ptr.vmem [resolvable:$true] %s219_s13 }
  0x49   : > { %s1077_s27 = scalar_lea.hbm %s1348_s28, 1024  ;;  %p1079_p0 = pneg %p1352_p10 }
  0x4a   : > { %p1078_p13 = scmp.ne.s32.totalorder %s1348_s28, %s1077_s27  ;;  %s1082_s6 = scalar_lea.hbm %s1486_s0, 4096 }
  0x4b   : > { %p1083_p7 = scmp.lt.u32.totalorder %s1348_s28, %s1486_s0  ;;  %p1084_p9 = scmp.lt.u32.totalorder %s1082_s6, %s1077_s27 }
  0x4c   : > { %p1080_p3 = pnand %p1079_p0, %p1078_p13  ;;  %p1086_p1 = scmp.lt.u32.totalorder %s1077_s27, %s1348_s28 }
  0x4d   : > { %p1085_p12 = por %p1084_p9, %p1083_p7 }
  0x4e   : > { %p1081_p5 = pneg %p1080_p3 }
  0x4f   : > { %p1087_p2 = por %p1086_p1, %p1085_p12 }
  0x51   : > { %p1088_p4 = pnand %p1087_p2, %p1081_p5 }
  0x53   : > { %1091 = shalt.err (!%p1088_p4)
}
  0x54   : > { %s1092_s29 = scalar_lea.vmem %s1350_s13, 1024  ;;  %s1185_s12 = smov [#allocation2]  }
  0x55   : > { %p1093_p6 = scmp.ne.s32.totalorder %s1350_s13, %s1092_s29  ;;  %s1097_s30 = sshll.u32 %s1185_s12, 4  ;;  %s1098_s30 = int_to_ptr.vmem [resolvable:$false] %s1097_s30 }
  0x56   : > { %s1099_s9 = scalar_lea.vmem %s1098_s30, 2048  ;;  %p1100_p3 = scmp.lt.s32.totalorder %s1350_s13, %s1098_s30 }
  0x57   : > { %p1095_p11 = pnand %p1093_p6, %p1079_p0  ;;  %p1101_p7 = scmp.lt.s32.totalorder %s1099_s9, %s1092_s29 }
  0x59   : > { %p1096_p13 = pneg %p1095_p11  ;;  %p1102_p9 = por %p1101_p7, %p1100_p3 }
  0x5b   : > { %p1103_p12 = pnand %p1102_p9, %p1096_p13 }
  0x5d   : > { %1106 = shalt.err (!%p1103_p12)
}
  0x5e   : > { %929 = dma.hbm_to_vmem [thread:$0]  (!%p1352_p10), %s1348_s28, 1024, %s1350_s13, %s1356_s17, %s1181_s15, %s1181_s15, %s1182_s16  }
  0x5f   : > { %p1502_p0 = scmp.ne.s32.totalorder %s1497_s26, 0 }
  0x60   : > { %s1390_s27 = sand.u32 (!%p1502_p0), 1, %s1169_s19   ;;  %p1503_p5 = scmp.ne.s32.totalorder (!%p1502_p0), %s1495_s24, 0 }
  0x61   : > { %231 = sbr.rel (%p1502_p0) target bundleno = 623 (0x26f), region = 40  ;;  %s823_s6 = sshll.u32 (!%p1502_p0), %s1390_s27, 6 }
  0x62   : > { %s234_s10 = scalar_lea.sflag (!%p1502_p0), [#allocation3], %s1390_s27  ;;  %s1396_s14 = scalar_lea.vmem (!%p1502_p0), [#allocation2], %s823_s6 }
  0x68   : > { %1152 = dma.done.wait (%p1503_p5), %s234_s10, 1024  }
  0x69   : > { %1154 = vsyncadd (%p1503_p5), %s234_s10, 4294966272  ;;  %p1504_p10 = scmp.eq.s32.totalorder %s1241_s22, 0 }
  0x6b   : > { %1156 = dma.done.wait (%p1504_p10), [#allocation6], 4096   ;;  %p1505_p1 = pmov %p1504_p10 }
  0x6c   : > { %v1186_v0 = vmov 0   ;;  %v981_v1 = vld [vmem:[#allocation5 + $0x4] ss:$8 sps:$4 sm:$0xff]   ;;  %v983_v2 = vld [vmem:[#allocation5] ss:$8 sps:$4 sm:$0xff]   ;;  %v1009_v16 = vld [vmem:[#allocation7 + $0x50] sm:$0xff]   ;;  %v305_v45 = vlaneseq }
  0x6d   : > { %1158 = vsyncadd (%p1505_p1), [#allocation6], 4294963200  ;;  %427 = vmatprep.mubr.bf16.mxu0 %v1186_v0  ;;  %395 = vmatprep.subr.bf16.mxu0 %v981_v1  ;;  %v984_v3 = vld [vmem:[#allocation5 + $0x14] ss:$8 sps:$4 sm:$0xff]   ;;  %v986_v4 = vld [vmem:[#allocation5 + $0x10] ss:$8 sps:$4 sm:$0xff]  }
  0x6e   : > { %396 = vmatpush1.bf16.msra.mxu0 %v983_v2  ;;  %v987_v5 = vld [vmem:[#allocation5 + $0x24] ss:$8 sps:$4 sm:$0xff]   ;;  %v989_v6 = vld [vmem:[#allocation5 + $0x20] ss:$8 sps:$4 sm:$0xff]   ;;  %v990_v7 = vld [vmem:[#allocation5 + $0x34] ss:$8 sps:$4 sm:$0xff]  }
  0x6f   : > { %397 = vmatprep.subr.bf16.mxu0 %v984_v3  ;;  %v992_v8 = vld [vmem:[#allocation5 + $0x30] ss:$8 sps:$4 sm:$0xff]   ;;  %v993_v9 = vld [vmem:[#allocation5 + $0x44] ss:$8 sps:$4 sm:$0xff]   ;;  %v995_v10 = vld [vmem:[#allocation5 + $0x40] ss:$8 sps:$4 sm:$0xff]  }
  0x70   : > { %v996_v11 = vld [vmem:[#allocation5 + $0x54] ss:$8 sps:$4 sm:$0xff]   ;;  %v1005_v12 = vld [vmem:[#allocation7 + $0x40] sm:$0xff]   ;;  %v1007_v14 = vld [vmem:[#allocation7 + $0x48] sm:$0xff]   ;;  %v306_v46 = vshrl.u32 %v305_v45, 7  ;;  %s1426_s28 = scalar_lea.vmem [#allocation8], %s823_s6 }
  0x71   : > { %v1006_v13 = vld [vmem:[#allocation7] sm:$0xff]   ;;  %867 = vmatprep.subr.bf16.mxu1 %v1005_v12  ;;  %v1008_v15 = vld [vmem:[#allocation7 + $0x8] sm:$0xff]   ;;  %v998_v17 = vld [vmem:[#allocation5 + $0x50] ss:$8 sps:$4 sm:$0xff]   ;;  %s722_s13 = sshll.u32 %s1426_s28, 4  ;;  %s866_s17 = sshll.u32 %s1241_s22, 10  ;;  %s1436_s13 = int_to_ptr.vmem [resolvable:$true] %s722_s13 }
  0x72   : > { %398 = vmatpush1.bf16.msra.mxu0 %v986_v4  ;;  %868 = vmatpush3.bf16.msra.mxu1 %v1006_v13  ;;  %v999_v18 = vld [vmem:[#allocation5 + $0x64] ss:$8 sps:$4 sm:$0xff]   ;;  %v1001_v19 = vld [vmem:[#allocation5 + $0x60] ss:$8 sps:$4 sm:$0xff]   ;;  %v1010_v20 = vld [vmem:[#allocation7 + $0x10] sm:$0xff]   ;;  %v307_v47 = vsub.s32 0, %v306_v46  ;;  %s1441_s12 = scalar_lea.hbm %s1491_s5, %s866_s17 }
  0x73   : > { %399 = vmatprep.subr.bf16.mxu0 %v987_v5  ;;  %869 = vmatprep.subr.bf16.mxu1 %v1007_v14  ;;  %v1011_v21 = vld [vmem:[#allocation7 + $0x58] sm:$0xff]   ;;  %v1013_v24 = vld [vmem:[#allocation7 + $0x60] sm:$0xff]   ;;  %v276_v27 = vld [vmem:[%s1396_s14 + $0x8] sm:$0xff]  ;;  %v311_v49 = vsub.s32 1, %v306_v46  ;;  %s709_s30 = scalar_lea.sflag [#allocation4], %s1390_s27  ;;  %s1107_s9 = scalar_lea.vmem %s1436_s13, 1024 }
  0x74   : > { %v1002_v22 = vld [vmem:[#allocation5 + $0x74] ss:$8 sps:$4 sm:$0xff]   ;;  %v1004_v25 = vld [vmem:[#allocation5 + $0x70] ss:$8 sps:$4 sm:$0xff]   ;;  %v275_v26 = vld [vmem:[%s1396_s14] sm:$0xff]  ;;  %p1108_p2 = scmp.ne.s32.totalorder %s1436_s13, %s1107_s9  ;;  %s1187_s22 = smov [#allocation8]  }
  0x75   : > { %v1012_v23 = vld [vmem:[#allocation7 + $0x18] sm:$0xff]   ;;  %v1014_v28 = vld [vmem:[#allocation7 + $0x20] sm:$0xff]   ;;  %v283_v29 = vpack.c.bf16 %v276_v27, %v275_v26  ;;  %v1015_v30 = vld [vmem:[#allocation7 + $0x68] sm:$0xff]   ;;  %s1111_s6 = sshll.u32 %s1187_s22, 4  ;;  %s1112_s6 = int_to_ptr.vmem [resolvable:$false] %s1111_s6 }
  0x76   : > { %400 = vmatpush1.bf16.msra.mxu0 %v989_v6  ;;  %870 = vmatpush3.bf16.msra.mxu1 %v1008_v15  ;;  %v277_v31 = vld [vmem:[%s1396_s14 + $0x10] sm:$0xff]  ;;  %v278_v32 = vld [vmem:[%s1396_s14 + $0x18] sm:$0xff]  ;;  %v279_v34 = vld [vmem:[%s1396_s14 + $0x20] sm:$0xff]  ;;  %p1109_p4 = pnand %p1108_p2, %p1338_p8  ;;  %s1113_s10 = scalar_lea.vmem %s1112_s6, 2048 }
  0x77   : > { %401 = vmatprep.subr.bf16.mxu0 %v990_v7  ;;  %871 = vmatprep.subr.bf16.mxu1 %v1009_v16  ;;  %v284_v33 = vpack.c.bf16 %v278_v32, %v277_v31  ;;  %v280_v35 = vld [vmem:[%s1396_s14 + $0x28] sm:$0xff]  ;;  %v281_v37 = vld [vmem:[%s1396_s14 + $0x30] sm:$0xff]  ;;  %v282_v38 = vld [vmem:[%s1396_s14 + $0x38] sm:$0xff]  ;;  %p1114_p11 = scmp.lt.s32.totalorder %s1436_s13, %s1112_s6  ;;  %p1115_p13 = scmp.lt.s32.totalorder %s1113_s10, %s1107_s9 }
  0x78   : > { %v285_v36 = vpack.c.bf16 %v280_v35, %v279_v34  ;;  %v286_v39 = vpack.c.bf16 %v282_v38, %v281_v37  ;;  %v1016_v40 = vld [vmem:[#allocation7 + $0x28] sm:$0xff]   ;;  %v1017_v41 = vld [vmem:[#allocation7 + $0x70] sm:$0xff]   ;;  %v1019_v43 = vld [vmem:[#allocation7 + $0x78] sm:$0xff]   ;;  %p1110_p6 = pneg %p1109_p4 }
  0x79   : > { %v1018_v42 = vld [vmem:[#allocation7 + $0x30] sm:$0xff]   ;;  %v1020_v44 = vld [vmem:[#allocation7 + $0x38] sm:$0xff]   ;;  %v303_v48 = vld [vmem:[%s1488_s2] sm:$0x3]  ;;  %p1116_p3 = por %p1115_p13, %p1114_p11 }
  0x7a   : > { %402 = vmatpush1.bf16.msra.mxu0 %v992_v8  ;;  %872 = vmatpush3.bf16.msra.mxu1 %v1010_v20  ;;  %v308_v50 = vrot.slane %v303_v48, %v307_v47  ;;  %v312_v51 = vrot.slane %v303_v48, %v311_v49  ;;  %v843_v45 = vld [vmem:[%s1490_s4] ss:$0 sm:$0xff] }
  0x7b   : > { %403 = vmatprep.subr.bf16.mxu0 %v993_v9  ;;  %873 = vmatprep.subr.bf16.mxu1 %v1011_v21  ;;  %p1117_p7 = pnand %p1116_p3, %p1110_p6 }
  0x7e   : > { %404 = vmatpush1.bf16.msra.mxu0 %v995_v10  ;;  %874 = vmatpush3.bf16.msra.mxu1 %v1012_v23 }
  0x7f   : > { %405 = vmatprep.subr.bf16.mxu0 %v996_v11  ;;  %875 = vmatprep.subr.bf16.mxu1 %v1013_v24 }
  0x82   : > { %406 = vmatpush1.bf16.msra.mxu0 %v998_v17  ;;  %876 = vmatpush3.bf16.msra.mxu1 %v1014_v28 }
  0x83   : > { %407 = vmatprep.subr.bf16.mxu0 %v999_v18  ;;  %877 = vmatprep.subr.bf16.mxu1 %v1015_v30 }
  0x86   : > { %408 = vmatpush1.bf16.msra.mxu0 %v1001_v19  ;;  %878 = vmatpush3.bf16.msra.mxu1 %v1016_v40 }
  0x87   : > { %409 = vmatprep.subr.bf16.mxu0 %v1002_v22  ;;  %879 = vmatprep.subr.bf16.mxu1 %v1017_v41 }
  0x8a   : > { %410 = vmatpush1.bf16.msra.mxu0 %v1004_v25  ;;  %880 = vmatpush3.bf16.msra.mxu1 %v1018_v42 }
  0x8b   : > { %881 = vmatprep.subr.bf16.mxu1 %v1019_v43 }
  0x8d   : > { %428 = vmatmul.mubr.bf16.vlgmr.msra.gmra.mrb[0].mxu0 %v283_v29 }
  0x8e   : > { %437 = vmatprep.mubr.bf16.mxu0 %v1186_v0  ;;  %882 = vmatpush3.bf16.msra.mxu1 %v1020_v44 }
  0x95   : > { %438 = vmatmul.mubr.bf16.gmra.mrb[4].mxu0 %v284_v33 }
  0x96   : > { %447 = vmatprep.mubr.bf16.mxu0 %v1186_v0 }
  0x9d   : > { %448 = vmatmul.mubr.bf16.gmra.mrb[8].mxu0 %v285_v36 }
  0x9e   : > { %457 = vmatprep.mubr.bf16.mxu0 %v1186_v0 }
  0xa5   : > { %458 = vmatmul.mubr.bf16.gmra.mrb[12].mxu0 %v286_v39 }
 0x160   : > { %v429_v52 = vpop.f32.mrb[0].mxu0 }
 0x161   : > { %v430_v53 = vadd.f32 %v429_v52, %v308_v50  ;;  %v431_v54 = vpop.f32.mrb[1].mxu0 }
 0x162   : > { %v432_v55 = vadd.f32 %v431_v54, %v312_v51  ;;  %v433_v56 = vpop.f32.mrb[2].mxu0 }
 0x163   : > { %v434_v57 = vadd.f32 %v433_v56, %v308_v50  ;;  %v435_v58 = vpop.f32.mrb[3].mxu0  ;;  %v468_v60 = vmax.f32 %v430_v53, 0.0 }
 0x164   : > { %v436_v59 = vadd.f32 %v435_v58, %v312_v51  ;;  %v469_v62 = vmax.f32 %v432_v55, 0.0 }
 0x165   : > { %v470_v61 = vmax.f32 %v434_v57, 0.0 }
 0x166   : > { %v471_v63 = vmax.f32 %v436_v59, 0.0 }
 0x167   : > { %v484_v0 = vpack.c.bf16 %v470_v61, %v468_v60 }
 0x168   : > { %v439_v1 = vpop.f32.mrb[4].mxu0  ;;  %v485_v2 = vpack.c.bf16 %v471_v63, %v469_v62 }
 0x169   : > { %v440_v3 = vadd.f32 %v439_v1, %v308_v50  ;;  %v441_v4 = vpop.f32.mrb[5].mxu0 }
 0x16a   : > { %v442_v5 = vadd.f32 %v441_v4, %v312_v51  ;;  %v443_v6 = vpop.f32.mrb[6].mxu0  ;;  %659 = vmatprep.mubr.bf16.mxu1 %v485_v2 }
 0x16b   : > { %v444_v7 = vadd.f32 %v443_v6, %v308_v50  ;;  %v445_v8 = vpop.f32.mrb[7].mxu0  ;;  %660 = vmatmul.mubr.bf16.vlgmr.msra.gmra.mrb[0].mxu1 %v484_v0  ;;  %v472_v10 = vmax.f32 %v440_v3, 0.0 }
 0x16c   : > { %v446_v9 = vadd.f32 %v445_v8, %v312_v51  ;;  %v473_v12 = vmax.f32 %v442_v5, 0.0 }
 0x16d   : > { %v474_v11 = vmax.f32 %v444_v7, 0.0 }
 0x16e   : > { %v475_v13 = vmax.f32 %v446_v9, 0.0 }
 0x16f   : > { %v486_v14 = vpack.c.bf16 %v474_v11, %v472_v10 }
 0x170   : > { %v487_v15 = vpack.c.bf16 %v475_v13, %v473_v12  ;;  %v449_v16 = vpop.f32.mrb[8].mxu0 }
 0x171   : > { %v450_v17 = vadd.f32 %v449_v16, %v308_v50  ;;  %v451_v18 = vpop.f32.mrb[9].mxu0 }
 0x172   : > { %v452_v19 = vadd.f32 %v451_v18, %v312_v51  ;;  %v453_v20 = vpop.f32.mrb[10].mxu0  ;;  %667 = vmatprep.mubr.bf16.mxu1 %v487_v15 }
 0x173   : > { %v454_v21 = vadd.f32 %v453_v20, %v308_v50  ;;  %v455_v22 = vpop.f32.mrb[11].mxu0  ;;  %668 = vmatmul.mubr.bf16.gmra.mrb[4].mxu1 %v486_v14  ;;  %v476_v24 = vmax.f32 %v450_v17, 0.0 }
 0x174   : > { %v456_v23 = vadd.f32 %v455_v22, %v312_v51  ;;  %v477_v26 = vmax.f32 %v452_v19, 0.0 }
 0x175   : > { %v478_v25 = vmax.f32 %v454_v21, 0.0 }
 0x176   : > { %v479_v27 = vmax.f32 %v456_v23, 0.0 }
 0x177   : > { %v488_v28 = vpack.c.bf16 %v478_v25, %v476_v24 }
 0x178   : > { %v489_v29 = vpack.c.bf16 %v479_v27, %v477_v26  ;;  %v459_v30 = vpop.f32.mrb[12].mxu0 }
 0x179   : > { %v460_v31 = vadd.f32 %v459_v30, %v308_v50  ;;  %v461_v32 = vpop.f32.mrb[13].mxu0 }
 0x17a   : > { %v462_v33 = vadd.f32 %v461_v32, %v312_v51  ;;  %v463_v34 = vpop.f32.mrb[14].mxu0  ;;  %675 = vmatprep.mubr.bf16.mxu1 %v489_v29 }
 0x17b   : > { %v464_v35 = vadd.f32 %v463_v34, %v308_v50  ;;  %v465_v36 = vpop.f32.mrb[15].mxu0  ;;  %676 = vmatmul.mubr.bf16.gmra.mrb[8].mxu1 %v488_v28  ;;  %v480_v38 = vmax.f32 %v460_v31, 0.0 }
 0x17c   : > { %v466_v37 = vadd.f32 %v465_v36, %v312_v51  ;;  %v481_v40 = vmax.f32 %v462_v33, 0.0 }
 0x17d   : > { %v482_v39 = vmax.f32 %v464_v35, 0.0 }
 0x17e   : > { %v483_v41 = vmax.f32 %v466_v37, 0.0 }
 0x17f   : > { %v490_v42 = vpack.c.bf16 %v482_v39, %v480_v38 }
 0x180   : > { %v491_v43 = vpack.c.bf16 %v483_v41, %v481_v40 }
 0x182   : > { %683 = vmatprep.mubr.bf16.mxu1 %v491_v43 }
 0x183   : > { %684 = vmatmul.mubr.bf16.gmra.mrb[12].mxu1 %v490_v42 }
 0x23e   : > { %v883_v44 = vpop.f32.mrb[0].mxu1 }
 0x23f   : > { %v884_v46 = vpop.f32.mrb[1].mxu1 }
 0x240   : > { %v885_v47 = vadd.f32 %v884_v46, %v883_v44  ;;  %v886_v48 = vpop.f32.mrb[2].mxu1 }
 0x241   : > { %v887_v49 = vpop.f32.mrb[3].mxu1 }
 0x242   : > { %v662_v50 = vadd.f32 %v885_v47, %v843_v45  ;;  %v888_v51 = vadd.f32 %v887_v49, %v886_v48 }
 0x244   : > { %v692_v52 = vmax.f32 %v662_v50, 0.0  ;;  %v665_v53 = vadd.f32 %v888_v51, %v843_v45 }
 0x246   : > { %700 = vst [vmem:[%s1426_s28] sm:$0xff] %v692_v52  ;;  %v693_v54 = vmax.f32 %v665_v53, 0.0  ;;  %v889_v55 = vpop.f32.mrb[4].mxu1 }
 0x247   : > { %v890_v56 = vpop.f32.mrb[5].mxu1 }
 0x248   : > { %701 = vst [vmem:[%s1426_s28 + $0x8] sm:$0xff] %v693_v54  ;;  %v891_v57 = vadd.f32 %v890_v56, %v889_v55  ;;  %v892_v58 = vpop.f32.mrb[6].mxu1 }
 0x249   : > { %v893_v59 = vpop.f32.mrb[7].mxu1 }
 0x24a   : > { %v670_v60 = vadd.f32 %v891_v57, %v843_v45  ;;  %v894_v61 = vadd.f32 %v893_v59, %v892_v58 }
 0x24c   : > { %v694_v62 = vmax.f32 %v670_v60, 0.0  ;;  %v673_v63 = vadd.f32 %v894_v61, %v843_v45 }
 0x24e   : > { %702 = vst [vmem:[%s1426_s28 + $0x10] sm:$0xff] %v694_v62  ;;  %v695_v0 = vmax.f32 %v673_v63, 0.0  ;;  %v895_v1 = vpop.f32.mrb[8].mxu1 }
 0x24f   : > { %v896_v2 = vpop.f32.mrb[9].mxu1 }
 0x250   : > { %703 = vst [vmem:[%s1426_s28 + $0x18] sm:$0xff] %v695_v0  ;;  %v897_v3 = vadd.f32 %v896_v2, %v895_v1  ;;  %v898_v4 = vpop.f32.mrb[10].mxu1 }
 0x251   : > { %v899_v5 = vpop.f32.mrb[11].mxu1 }
 0x252   : > { %v678_v6 = vadd.f32 %v897_v3, %v843_v45  ;;  %v900_v7 = vadd.f32 %v899_v5, %v898_v4 }
 0x254   : > { %v696_v8 = vmax.f32 %v678_v6, 0.0  ;;  %v681_v9 = vadd.f32 %v900_v7, %v843_v45 }
 0x256   : > { %704 = vst [vmem:[%s1426_s28 + $0x20] sm:$0xff] %v696_v8  ;;  %v697_v10 = vmax.f32 %v681_v9, 0.0  ;;  %v901_v11 = vpop.f32.mrb[12].mxu1 }
 0x257   : > { %v902_v12 = vpop.f32.mrb[13].mxu1 }
 0x258   : > { %705 = vst [vmem:[%s1426_s28 + $0x28] sm:$0xff] %v697_v10  ;;  %v903_v13 = vadd.f32 %v902_v12, %v901_v11  ;;  %v904_v14 = vpop.f32.mrb[14].mxu1 }
 0x259   : > { %v905_v15 = vpop.f32.mrb[15].mxu1 }
 0x25a   : > { %v686_v16 = vadd.f32 %v903_v13, %v843_v45  ;;  %v906_v17 = vadd.f32 %v905_v15, %v904_v14 }
 0x25c   : > { %v698_v18 = vmax.f32 %v686_v16, 0.0  ;;  %v689_v19 = vadd.f32 %v906_v17, %v843_v45 }
 0x25e   : > { %706 = vst [vmem:[%s1426_s28 + $0x30] sm:$0xff] %v698_v18  ;;  %v699_v20 = vmax.f32 %v689_v19, 0.0 }
 0x260   : > { %707 = vst [vmem:[%s1426_s28 + $0x38] sm:$0xff] %v699_v20 }
 0x261   : > { %1120 = shalt.err (!%p1117_p7)
}
 0x262   : > { %s1121_s14 = scalar_lea.hbm %s1441_s12, 1024  ;;  %s1125_s15 = scalar_lea.hbm %s1491_s5, 4096 }
 0x263   : > { %p1122_p9 = scmp.ne.s32.totalorder %s1441_s12, %s1121_s14  ;;  %p1126_p5 = scmp.lt.u32.totalorder %s1441_s12, %s1491_s5 }
 0x264   : > { %p1127_p10 = scmp.lt.u32.totalorder %s1125_s15, %s1121_s14  ;;  %p1129_p2 = scmp.lt.u32.totalorder %s1121_s14, %s1441_s12 }
 0x265   : > { %p1123_p12 = pnand %p1122_p9, %p1338_p8 }
 0x266   : > { %p1128_p1 = por %p1127_p10, %p1126_p5 }
 0x267   : > { %p1124_p0 = pneg %p1123_p12 }
 0x268   : > { %p1130_p4 = por %p1129_p2, %p1128_p1 }
 0x26a   : > { %p1131_p6 = pnand %p1130_p4, %p1124_p0 }
 0x26c   : > { %1134 = shalt.err (!%p1131_p6)
}
 0x26d   : > { %s1188_s17 = smov 128   ;;  %s1189_s11 = smov 8  }
 0x26e   : > { %917 = dma.vmem_to_hbm [thread:$0]  (%p1338_p8), %s1436_s13, 1024, %s1441_s12, %s709_s30, %s1188_s17, %s1188_s17, %s1189_s11  }
 0x26f PF: > { %p939_p11 = scmp.ge.s32.totalorder %s1177_s21, 2  ;;  %s737_s29 = sand.u32 1, %s1165_s18  }
 0x270   : > { %p1506_p13 = scmp.ne.s32.totalorder %s1496_s25, 0  ;;  %s738_s9 = scalar_lea.sflag [#allocation4], %s737_s29 }
 0x272   : > { %p931_p3 = pnand %p939_p11, %p1506_p13 }
 0x274   : > { %1160 = dma.done.wait (!%p931_p3), %s738_s9, 1024  }
 0x275   : > { %1162 = vsyncadd (!%p931_p3), %s738_s9, 4294966272  ;;  %p19_p7 = scmp.ge.s32.totalorder %s1325_s23, 6   ;;  %s1507_s18 = smov %s1169_s19 }
 0x276   : > { %s1508_s19 = smov %s1173_s20  ;;  %s1509_s20 = smov %s1334_s7 }
 0x277   : > { %s1510_s21 = smov %s1325_s23  ;;  %21 = sbr.rel (!%p19_p7) target bundleno = 6 (0x6), region = 93 }
 0x27e   :  { %743 = vsyncpa [#allocation3], 1 }
 0x27f   :  { %745 = vsyncpa [#allocation3 + $0x1], 1 }
 0x280   :  { %746 = vsyncpa [#allocation6], 1 }
 0x281   :  { %747 = vsyncpa [#allocation4], 1 }
 0x282   :  { %749 = vsyncpa [#allocation4 + $0x1], 1 }

</bundles_post_ra>
